<compile_context>
chip_gen: v7x
topology: tpu7x:2x2x1
jax: 0.10.0
libtpu: 0.0.40
codegen_flags: <defaults>
</compile_context>

<pallas_src>
import jax
import jax.numpy as jnp
from jax.experimental import pallas as pl
from jax.experimental.pallas import tpu as pltpu


def _cls_head_kernel(x_ref, w1_ref, b1_ref, w2_ref, b2_ref, out_ref):
    """Fused head on one batch tile: tanh(x @ W1 + b1) @ W2 + b2.

    x_ref  : [TB, D]   VMEM  (CLS hidden states; cast to weight dtype for the MXU)
    w1_ref : [D, H]    VMEM  (resident across grid steps, single-buffered)
    b1_ref : [1, H]    VMEM  (f32)
    w2_ref : [H, Cp]   VMEM  (resident, Cp = num_classes padded to 128 lanes)
    b2_ref : [1, Cp]   VMEM  (f32)
    out_ref: [TB, Cp]  VMEM  (logits)
    """
    x = x_ref[...]
    if x.dtype != w1_ref.dtype:
        x = x.astype(w1_ref.dtype)  # keep the MXU on its fast (bf16) path
    # dense: Linear(D -> H); f32 accumulation on the MXU.
    h = jnp.dot(x, w1_ref[...], preferred_element_type=jnp.float32)
    h = h + b1_ref[...]  # bias-add in f32 (VPU)
    # TODO(synk): dropout (p=pooler_dropout) is identity at inference; training-mode RNG
    #             dropout is not implemented here.
    # tanh in the second-matmul operand dtype: bf16 doubles EUP throughput on v6e/v7x and
    # the activation is cast to that dtype for the MXU anyway (f32 when weights are f32).
    h = jnp.tanh(h.astype(w2_ref.dtype))
    # out_proj: Linear(H -> Cp).
    y = jnp.dot(h, w2_ref[...], preferred_element_type=jnp.float32)
    out_ref[...] = (y + b2_ref[...]).astype(out_ref.dtype)


def _pick_batch_tile(B, tile_b):
    """Choose the batch tile.

    - B <= tile_b: use the full batch (always layout-legal); split in two when large
      enough so v7x's second TensorCore gets a tile.
    - otherwise: round the request to a multiple of 256 (full v6e/v7x MXU, also a multiple
      of v5e's 128 and the bf16 (16,128) tile) and prefer a tile that divides B so the
      final grid step isn't ragged wasted work.
    """
    if B <= tile_b:
        if B >= 512 and (B // 2) % 16 == 0:
            return B // 2  # two tiles -> both v7x TensorCores busy
        return B
    tb = 0
    for align in (256, 128, 16, 8):
        tb = (tile_b // align) * align
        if tb:
            break
    tb = max(tb, min(B, 8))
    # Prefer a divisor of B among MXU-friendly sizes in [tb // 2, tb].
    for align in (256, 128, 16, 8):
        if tb % align:
            continue
        cand = tb
        while cand >= max(align, tb // 2):
            if B % cand == 0:
                return cand
            cand -= align
    return tb  # ragged last step: correct (stores clipped), just slightly wasteful


def roberta_classification_head(features, w1, b1, w2, b2, *, tile_b=1024,
                                out_dtype=jnp.float32):
    """features: [B, T, D]. w1:[D,H] b1:[H] w2:[H,C] b2:[C]. Returns logits [B, C]."""
    B, T, D = features.shape
    H = w1.shape[-1]
    C = w2.shape[-1]

    # ---- lane-dense out_proj: pad num_classes to exactly 128 lanes (zero columns) -------
    C_pad = max(128, pl.cdiv(C, 128) * 128)
    if C_pad != C:
        w2 = jnp.pad(w2, ((0, 0), (0, C_pad - C)))
        b2 = jnp.pad(b2, ((0, C_pad - C),))
    b1_2d = b1.reshape(1, H).astype(jnp.float32)
    b2_2d = b2.reshape(1, C_pad).astype(jnp.float32)

    # ---- fuse the CLS slice into the kernel's DMA ---------------------------------------
    # View features as [B, T*D] (contiguous reshape, no HBM copy) and let the x BlockSpec
    # read only lanes [0, D) of each row — exactly features[:, 0, :].
    if T == 1 or D % 128 == 0:
        x_in = features.reshape(B, T * D)
    else:
        # TODO(synk): lane-unaligned hidden sizes (D % 128 != 0) fall back to a wrapper
        #             slice (extra HBM pass); production RoBERTa D=768/1024 takes the
        #             fused path.
        x_in = features[:, 0, :]

    # ---- batch tiling --------------------------------------------------------------------
    tb = _pick_batch_tile(B, tile_b)
    nb = pl.cdiv(B, tb)

    # ---- explicit VMEM budget (v5e default scoped 16 MiB / v7x physical 64 MiB) ----------
    x_bytes = jnp.dtype(x_in.dtype).itemsize
    out_bytes = jnp.dtype(out_dtype).itemsize
    needed = (2 * tb * D * x_bytes                       # x tile, double-buffered
              + 2 * tb * C_pad * out_bytes               # out tile, double-buffered
              + 2 * (D * H * jnp.dtype(w1.dtype).itemsize + H * 4)        # W1+b1 (worst case 2x)
              + 2 * (H * C_pad * jnp.dtype(w2.dtype).itemsize + C_pad * 4))  # W2+b2
    vmem_limit = int(max(32 << 20, min(int(needed * 1.5) + (1 << 20), 96 << 20)))

    cost = pl.CostEstimate(
        flops=2 * B * D * H + 2 * B * H * C_pad,
        transcendentals=B * H,
        bytes_accessed=(B * D * x_bytes
                        + D * H * jnp.dtype(w1.dtype).itemsize + H * 4
                        + H * C_pad * jnp.dtype(w2.dtype).itemsize + C_pad * 4
                        + B * C_pad * out_bytes),
    )

    def _make_call(weight_buffers):
        w_kw = dict(pipeline_mode=pl.Buffered(1)) if weight_buffers == 1 else {}
        return pl.pallas_call(
            _cls_head_kernel,
            out_shape=jax.ShapeDtypeStruct((B, C_pad), out_dtype),
            grid=(nb,),
            in_specs=[
                # CLS tile, pipelined over the batch.
                pl.BlockSpec((tb, D), lambda i: (i, 0)),
                # Invariant weights/biases: constant index_map -> fetched once, VMEM-resident.
                pl.BlockSpec((D, H), lambda i: (0, 0), **w_kw),
                pl.BlockSpec((1, H), lambda i: (0, 0), **w_kw),
                pl.BlockSpec((H, C_pad), lambda i: (0, 0), **w_kw),
                pl.BlockSpec((1, C_pad), lambda i: (0, 0), **w_kw),
            ],
            out_specs=pl.BlockSpec((tb, C_pad), lambda i: (i, 0)),
            compiler_params=pltpu.CompilerParams(
                # Batch tiles are independent: megacore / v7x 2-TC sharding.
                dimension_semantics=("parallel",),
                vmem_limit_bytes=vmem_limit,
            ),
            cost_estimate=cost,
        )

    try:
        out = _make_call(1)(x_in, w1, b1_2d, w2, b2_2d)
    except Exception:
        # TODO(synk): fallback for jax builds that reject single-buffer pipeline_mode;
        #             identical semantics, just default double-buffered weights.
        out = _make_call(2)(x_in, w1, b1_2d, w2, b2_2d)

    return out[:, :C] if C_pad != C else out


if __name__ == "__main__":
    # Small, module-consistent shapes (lane-aligned hidden so the fused-CLS path is taken;
    # second call uses a small tile so the multi-step pipelined grid path is exercised).
    B, T = 32, 8
    input_dim = 128      # hidden size of features (D)
    inner_dim = 128      # dense inner dim (H)
    num_classes = 4      # C

    key = jax.random.PRNGKey(0)
    k_feat, k_w1, k_b1, k_w2, k_b2 = jax.random.split(key, 5)

    # bf16 activations/weights (MXU-native), f32 biases.
    features = jax.random.normal(k_feat, (B, T, input_dim), dtype=jnp.float32).astype(jnp.bfloat16)
    w1 = (jax.random.normal(k_w1, (input_dim, inner_dim), dtype=jnp.float32) * 0.05).astype(jnp.bfloat16)
    b1 = jax.random.normal(k_b1, (inner_dim,), dtype=jnp.float32) * 0.01
    w2 = (jax.random.normal(k_w2, (inner_dim, num_classes), dtype=jnp.float32) * 0.05).astype(jnp.bfloat16)
    b2 = jax.random.normal(k_b2, (num_classes,), dtype=jnp.float32) * 0.01

    # Reference (plain JAX, f32 math on the same bf16 inputs).
    x32 = features[:, 0, :].astype(jnp.float32)
    ref = jnp.tanh(x32 @ w1.astype(jnp.float32) + b1) @ w2.astype(jnp.float32) + b2

    # 1) Default schedule: single full-batch tile.
    out = jax.block_until_ready(roberta_classification_head(features, w1, b1, w2, b2))
    assert out.shape == (B, num_classes)
    assert out.dtype == jnp.float32
    assert jnp.allclose(out, ref, atol=1e-2, rtol=1e-2), "mismatch vs reference (default tile)"

    # 2) Small tile: exercises the multi-step pipelined grid.
    out2 = jax.block_until_ready(
        roberta_classification_head(features, w1, b1, w2, b2, tile_b=16))
    assert jnp.allclose(out2, ref, atol=1e-2, rtol=1e-2), "mismatch vs reference (tiled)"

    print("KERNEL_OK")
</pallas_src>

<mosaic_0001>
module attributes {stable_mosaic.version = 11 : i64} {
  func.func @_cls_head_kernel(%arg0: i32, %arg1: memref<32x128xbf16, #tpu.memory_space<vmem>>, %arg2: memref<128x128xbf16, #tpu.memory_space<vmem>>, %arg3: memref<1x128xf32, #tpu.memory_space<vmem>>, %arg4: memref<128x128xbf16, #tpu.memory_space<vmem>>, %arg5: memref<1x128xf32, #tpu.memory_space<vmem>>, %arg6: memref<32x128xf32, #tpu.memory_space<vmem>>) attributes {dimension_semantics = [#tpu.dimension_semantics<parallel>], iteration_bounds = array<i64: 1>, scalar_prefetch = 0 : i64, scratch_operands = 0 : i64, tpu.core_type = #tpu.core_type<tc>, window_params = [{transform_indices = @transform_0, window_bounds = array<i64: 32, 128>}, {pipeline_mode = #tpu.pipeline_mode<synchronous>, transform_indices = @transform_1, window_bounds = array<i64: 128, 128>}, {pipeline_mode = #tpu.pipeline_mode<synchronous>, transform_indices = @transform_2, window_bounds = array<i64: 1, 128>}, {pipeline_mode = #tpu.pipeline_mode<synchronous>, transform_indices = @transform_3, window_bounds = array<i64: 128, 128>}, {pipeline_mode = #tpu.pipeline_mode<synchronous>, transform_indices = @transform_4, window_bounds = array<i64: 1, 128>}, {transform_indices = @transform_5, window_bounds = array<i64: 32, 128>}]} {
    %c0 = arith.constant 0 : index
    %c0_0 = arith.constant 0 : index
    %0 = vector.load %arg1[%c0, %c0_0] : memref<32x128xbf16, #tpu.memory_space<vmem>>, vector<32x128xbf16>
    %c0_1 = arith.constant 0 : index
    %c0_2 = arith.constant 0 : index
    %1 = vector.load %arg2[%c0_1, %c0_2] : memref<128x128xbf16, #tpu.memory_space<vmem>>, vector<128x128xbf16>
    %cst = arith.constant dense<0.000000e+00> : vector<32x128xf32>
    %2 = tpu.matmul %0, %1, %cst {dimension_numbers = #tpu.dot_dimension_numbers<[1], [0], [0], [1], [0, 0, 1, 1], [], []>} : vector<32x128xbf16>, vector<128x128xbf16>, vector<32x128xf32> -> vector<32x128xf32>
    %c0_3 = arith.constant 0 : index
    %c0_4 = arith.constant 0 : index
    %3 = vector.load %arg3[%c0_3, %c0_4] : memref<1x128xf32, #tpu.memory_space<vmem>>, vector<1x128xf32>
    %4 = vector.broadcast %3 : vector<1x128xf32> to vector<32x128xf32>
    %5 = arith.addf %2, %4 : vector<32x128xf32>
    %6 = arith.truncf %5 : vector<32x128xf32> to vector<32x128xbf16>
    %7 = math.tanh %6 : vector<32x128xbf16>
    %c0_5 = arith.constant 0 : index
    %c0_6 = arith.constant 0 : index
    %8 = vector.load %arg4[%c0_5, %c0_6] : memref<128x128xbf16, #tpu.memory_space<vmem>>, vector<128x128xbf16>
    %cst_7 = arith.constant dense<0.000000e+00> : vector<32x128xf32>
    %9 = tpu.matmul %7, %8, %cst_7 {dimension_numbers = #tpu.dot_dimension_numbers<[1], [0], [0], [1], [0, 0, 1, 1], [], []>} : vector<32x128xbf16>, vector<128x128xbf16>, vector<32x128xf32> -> vector<32x128xf32>
    %c0_8 = arith.constant 0 : index
    %c0_9 = arith.constant 0 : index
    %10 = vector.load %arg5[%c0_8, %c0_9] : memref<1x128xf32, #tpu.memory_space<vmem>>, vector<1x128xf32>
    %11 = vector.broadcast %10 : vector<1x128xf32> to vector<32x128xf32>
    %12 = arith.addf %9, %11 : vector<32x128xf32>
    %c0_10 = arith.constant 0 : index
    %c0_11 = arith.constant 0 : index
    %13 = vector.load %arg6[%c0_10, %c0_11] : memref<32x128xf32, #tpu.memory_space<vmem>>, vector<32x128xf32>
    tpu.vector_store %arg6[%c0_10, %c0_11], %12 {strides = array<i32>} : memref<32x128xf32, #tpu.memory_space<vmem>>, vector<32x128xf32>,
    return
  }
  func.func @transform_0(%arg0: i32) -> (i32, i32) {
    %c0_i32 = arith.constant 0 : i32
    %c0_i32_0 = arith.constant 0 : i32
    return %arg0, %c0_i32 : i32, i32
  }
  func.func @transform_1(%arg0: i32) -> (i32, i32) {
    %c0_i32 = arith.constant 0 : i32
    %c0_i32_0 = arith.constant 0 : i32
    %c0_i32_1 = arith.constant 0 : i32
    return %c0_i32, %c0_i32_0 : i32, i32
  }
  func.func @transform_2(%arg0: i32) -> (i32, i32) {
    %c0_i32 = arith.constant 0 : i32
    %c0_i32_0 = arith.constant 0 : i32
    %c0_i32_1 = arith.constant 0 : i32
    return %c0_i32, %c0_i32_0 : i32, i32
  }
  func.func @transform_3(%arg0: i32) -> (i32, i32) {
    %c0_i32 = arith.constant 0 : i32
    %c0_i32_0 = arith.constant 0 : i32
    %c0_i32_1 = arith.constant 0 : i32
    return %c0_i32, %c0_i32_0 : i32, i32
  }
  func.func @transform_4(%arg0: i32) -> (i32, i32) {
    %c0_i32 = arith.constant 0 : i32
    %c0_i32_0 = arith.constant 0 : i32
    %c0_i32_1 = arith.constant 0 : i32
    return %c0_i32, %c0_i32_0 : i32, i32
  }
  func.func @transform_5(%arg0: i32) -> (i32, i32) {
    %c0_i32 = arith.constant 0 : i32
    %c0_i32_0 = arith.constant 0 : i32
    return %arg0, %c0_i32 : i32, i32
  }
}

module attributes {stable_mosaic.version = 11 : i64} {
  func.func @_cls_head_kernel(%arg0: i32, %arg1: memref<32x128xbf16, #tpu.memory_space<vmem>>, %arg2: memref<128x128xbf16, #tpu.memory_space<vmem>>, %arg3: memref<1x128xf32, #tpu.memory_space<vmem>>, %arg4: memref<128x128xbf16, #tpu.memory_space<vmem>>, %arg5: memref<1x128xf32, #tpu.memory_space<vmem>>, %arg6: memref<32x128xf32, #tpu.memory_space<vmem>>) attributes {dimension_semantics = [#tpu.dimension_semantics<parallel>], iteration_bounds = array<i64: 1>, scalar_prefetch = 0 : i64, scratch_operands = 0 : i64, tpu.core_type = #tpu.core_type<tc>, window_params = [{transform_indices = @transform_0, window_bounds = array<i64: 32, 128>}, {pipeline_mode = #tpu.pipeline_mode<synchronous>, transform_indices = @transform_1, window_bounds = array<i64: 128, 128>}, {pipeline_mode = #tpu.pipeline_mode<synchronous>, transform_indices = @transform_2, window_bounds = array<i64: 1, 128>}, {pipeline_mode = #tpu.pipeline_mode<synchronous>, transform_indices = @transform_3, window_bounds = array<i64: 128, 128>}, {pipeline_mode = #tpu.pipeline_mode<synchronous>, transform_indices = @transform_4, window_bounds = array<i64: 1, 128>}, {transform_indices = @transform_5, window_bounds = array<i64: 32, 128>}]} {
    %c0 = arith.constant 0 : index
    %c0_0 = arith.constant 0 : index
    %0 = vector.load %arg1[%c0, %c0_0] : memref<32x128xbf16, #tpu.memory_space<vmem>>, vector<32x128xbf16>
    %c0_1 = arith.constant 0 : index
    %c0_2 = arith.constant 0 : index
    %1 = vector.load %arg2[%c0_1, %c0_2] : memref<128x128xbf16, #tpu.memory_space<vmem>>, vector<128x128xbf16>
    %cst = arith.constant dense<0.000000e+00> : vector<32x128xf32>
    %2 = tpu.matmul %0, %1, %cst {dimension_numbers = #tpu.dot_dimension_numbers<[1], [0], [0], [1], [0, 0, 1, 1], [], []>} : vector<32x128xbf16>, vector<128x128xbf16>, vector<32x128xf32> -> vector<32x128xf32>
    %c0_3 = arith.constant 0 : index
    %c0_4 = arith.constant 0 : index
    %3 = vector.load %arg3[%c0_3, %c0_4] : memref<1x128xf32, #tpu.memory_space<vmem>>, vector<1x128xf32>
    %4 = vector.broadcast %3 : vector<1x128xf32> to vector<32x128xf32>
    %5 = arith.addf %2, %4 : vector<32x128xf32>
    %6 = arith.truncf %5 : vector<32x128xf32> to vector<32x128xbf16>
    %7 = math.tanh %6 : vector<32x128xbf16>
    %c0_5 = arith.constant 0 : index
    %c0_6 = arith.constant 0 : index
    %8 = vector.load %arg4[%c0_5, %c0_6] : memref<128x128xbf16, #tpu.memory_space<vmem>>, vector<128x128xbf16>
    %cst_7 = arith.constant dense<0.000000e+00> : vector<32x128xf32>
    %9 = tpu.matmul %7, %8, %cst_7 {dimension_numbers = #tpu.dot_dimension_numbers<[1], [0], [0], [1], [0, 0, 1, 1], [], []>} : vector<32x128xbf16>, vector<128x128xbf16>, vector<32x128xf32> -> vector<32x128xf32>
    %c0_8 = arith.constant 0 : index
    %c0_9 = arith.constant 0 : index
    %10 = vector.load %arg5[%c0_8, %c0_9] : memref<1x128xf32, #tpu.memory_space<vmem>>, vector<1x128xf32>
    %11 = vector.broadcast %10 : vector<1x128xf32> to vector<32x128xf32>
    %12 = arith.addf %9, %11 : vector<32x128xf32>
    %c0_10 = arith.constant 0 : index
    %c0_11 = arith.constant 0 : index
    %13 = vector.load %arg6[%c0_10, %c0_11] : memref<32x128xf32, #tpu.memory_space<vmem>>, vector<32x128xf32>
    tpu.vector_store %arg6[%c0_10, %c0_11], %12 {strides = array<i32>} : memref<32x128xf32, #tpu.memory_space<vmem>>, vector<32x128xf32>,
    return
  }
  func.func @transform_0(%arg0: i32) -> (i32, i32) {
    %c0_i32 = arith.constant 0 : i32
    %c0_i32_0 = arith.constant 0 : i32
    return %arg0, %c0_i32 : i32, i32
  }
  func.func @transform_1(%arg0: i32) -> (i32, i32) {
    %c0_i32 = arith.constant 0 : i32
    %c0_i32_0 = arith.constant 0 : i32
    %c0_i32_1 = arith.constant 0 : i32
    return %c0_i32, %c0_i32_0 : i32, i32
  }
  func.func @transform_2(%arg0: i32) -> (i32, i32) {
    %c0_i32 = arith.constant 0 : i32
    %c0_i32_0 = arith.constant 0 : i32
    %c0_i32_1 = arith.constant 0 : i32
    return %c0_i32, %c0_i32_0 : i32, i32
  }
  func.func @transform_3(%arg0: i32) -> (i32, i32) {
    %c0_i32 = arith.constant 0 : i32
    %c0_i32_0 = arith.constant 0 : i32
    %c0_i32_1 = arith.constant 0 : i32
    return %c0_i32, %c0_i32_0 : i32, i32
  }
  func.func @transform_4(%arg0: i32) -> (i32, i32) {
    %c0_i32 = arith.constant 0 : i32
    %c0_i32_0 = arith.constant 0 : i32
    %c0_i32_1 = arith.constant 0 : i32
    return %c0_i32, %c0_i32_0 : i32, i32
  }
  func.func @transform_5(%arg0: i32) -> (i32, i32) {
    %c0_i32 = arith.constant 0 : i32
    %c0_i32_0 = arith.constant 0 : i32
    return %arg0, %c0_i32 : i32, i32
  }
}

</mosaic_0001>

<bundles_post_ra>
// kernel: tpu_custom_call.1
= control target key start
LH: loop header
LB: loop body
LE: loop exit
PB: predicated region body
PF: predicated region fallthrough
CT: control target
= control target key end

     0   :  { %10 = vsyncpa [#allocation3], 0  ;;  %s661_s0 = inlined_call_operand.hbm [shape: bf16[32,1024], index: 0, kind: input, shape index: {}]   ;;  %s662_s1 = inlined_call_operand.hbm [shape: bf16[128,128], index: 1, kind: input, shape index: {}]   ;;  %s663_s2 = inlined_call_operand.vmem [shape: f32[1,128], index: 2, kind: input, shape index: {}]   ;;  %s664_s3 = inlined_call_operand.hbm [shape: bf16[128,128], index: 3, kind: input, shape index: {}]   ;;  %s665_s4 = inlined_call_operand.vmem [shape: f32[1,128], index: 4, kind: input, shape index: {}]   ;;  %s666_s5 = inlined_call_operand.hbm [shape: f32[32,128], index: 5, kind: output, shape index: {}]  }
   0x1   :  { %11 = vsyncpa [#allocation6], 0 }
   0x2   :  { %12 = vsyncpa [#allocation4], 0  ;;  %s550_s18 = smov [#allocation5]   ;;  %s551_s20 = smov [#allocation2]  }
   0x3   :  { %s30_s19 = sshll.u32 %s550_s18, 4  ;;  %s18_s21 = sshll.u32 %s551_s20, 4  ;;  %s31_s19 = int_to_ptr.vmem [resolvable:$true] %s30_s19  ;;  %s589_s21 = int_to_ptr.vmem [resolvable:$true] %s18_s21 }
   0x4   :  { %s456_s24 = scalar_lea.hbm %s662_s1, 1024 }
   0x5   :  { %p457_p0 = scmp.ne.s32.totalorder %s662_s1, %s456_s24  ;;  %p460_p1 = scmp.lt.u32.totalorder %s456_s24, %s662_s1 }
   0x7   :  { %p462_p2 = pnand %p460_p1, %p457_p0 }
   0x9   :  { %465 = shalt.err (!%p462_p2)
}
   0xa   :  { %s466_s29 = scalar_lea.vmem %s31_s19, 1024  ;;  %p471_p4 = scmp.lt.s32.totalorder %s31_s19, %s31_s19 }
   0xb   :  { %p467_p3 = scmp.ne.s32.totalorder %s31_s19, %s466_s29  ;;  %p472_p5 = scmp.lt.s32.totalorder %s466_s29, %s466_s29 }
   0xd   :  { %p473_p6 = por %p472_p5, %p471_p4 }
   0xf   :  { %p474_p7 = pnand %p473_p6, %p467_p3 }
  0x11   :  { %477 = shalt.err (!%p474_p7)
}
  0x12   :  { %s552_s30 = smov 64   ;;  %s553_s6 = smov 4  }
  0x13   :  { %36 = dma.hbm_to_vmem [thread:$0]  %s662_s1, 1024, %s31_s19, [#allocation6], %s552_s30, %s552_s30, %s553_s6  }
  0x14   :  { %s478_s11 = scalar_lea.hbm %s661_s0, 256  ;;  %s480_s16 = scalar_lea.hbm %s661_s0, 2048 }
  0x15   :  { %p479_p8 = scmp.ne.s32.totalorder %s661_s0, %s478_s11  ;;  %p481_p9 = scmp.lt.u32.totalorder %s480_s16, %s478_s11 }
  0x16   :  { %p482_p10 = scmp.lt.u32.totalorder %s478_s11, %s661_s0 }
  0x18   :  { %p483_p11 = por %p482_p10, %p481_p9 }
  0x1a   :  { %p484_p12 = pnand %p483_p11, %p479_p8 }
  0x1c   :  { %487 = shalt.err (!%p484_p12)
}
  0x1d   :  { %s488_s1 = scalar_lea.vmem %s589_s21, 256  ;;  %p493_p0 = scmp.lt.s32.totalorder %s589_s21, %s589_s21 }
  0x1e   :  { %p489_p13 = scmp.ne.s32.totalorder %s589_s21, %s488_s1  ;;  %p494_p1 = scmp.lt.s32.totalorder %s488_s1, %s488_s1 }
  0x20   :  { %p495_p2 = por %p494_p1, %p493_p0 }
  0x22   :  { %p496_p3 = pnand %p495_p2, %p489_p13 }
  0x24   :  { %499 = shalt.err (!%p496_p3)
}
  0x25   :  { %s554_s19 = smov 512   ;;  %s555_s23 = smov [#allocation7]  }
  0x26   :  { %24 = dma.hbm_to_vmem [thread:$0]  %s661_s0, 256, %s589_s21, [#allocation3], %s554_s19, %s552_s30, %s553_s6  }
  0x27   :  { %s44_s24 = sshll.u32 %s555_s23, 4  ;;  %s500_s27 = scalar_lea.hbm %s664_s3, 1024  ;;  %s45_s24 = int_to_ptr.vmem [resolvable:$true] %s44_s24 }
  0x28   :  { %p501_p4 = scmp.ne.s32.totalorder %s664_s3, %s500_s27  ;;  %p504_p5 = scmp.lt.u32.totalorder %s500_s27, %s664_s3 }
  0x2a   :  { %p506_p6 = pnand %p504_p5, %p501_p4 }
  0x2c   :  { %509 = shalt.err (!%p506_p6)
}
  0x2d   :  { %s510_s9 = scalar_lea.vmem %s45_s24, 1024  ;;  %p515_p8 = scmp.lt.s32.totalorder %s45_s24, %s45_s24 }
  0x2e   :  { %p511_p7 = scmp.ne.s32.totalorder %s45_s24, %s510_s9  ;;  %p516_p9 = scmp.lt.s32.totalorder %s510_s9, %s510_s9 }
  0x30   :  { %p517_p10 = por %p516_p9, %p515_p8 }
  0x32   :  { %p518_p11 = pnand %p517_p10, %p511_p7 }
  0x34   :  { %521 = shalt.err (!%p518_p11)
}
  0x35   :  { %50 = dma.hbm_to_vmem [thread:$0]  %s664_s3, 1024, %s45_s24, [#allocation6], %s552_s30, %s552_s30, %s553_s6  }
  0x36   :  { %544 = dma.done.wait [#allocation3], 256  }
  0x37   :  { %545 = vsyncadd [#allocation3], 4294967040 }
  0x38   :  { %546 = dma.done.wait [#allocation6], 2048  }
  0x39   :  { %547 = vsyncadd [#allocation6], 4294965248  ;;  %v434_v0 = vld [vmem:[#allocation5] sm:$0xff]   ;;  %v435_v1 = vld [vmem:[#allocation5 + $0x8] sm:$0xff]  }
  0x3a   :  { %385 = vmatprep.subr.bf16.mxu0 %v434_v0  ;;  %v436_v2 = vld [vmem:[#allocation5 + $0x10] sm:$0xff]   ;;  %v437_v3 = vld [vmem:[#allocation5 + $0x18] sm:$0xff]   ;;  %v438_v5 = vld [vmem:[#allocation5 + $0x20] sm:$0xff]  }
  0x3b   :  { %386 = vmatpush3.bf16.msra.mxu0 %v434_v0  ;;  %v442_v4 = vld [vmem:[#allocation2] sm:$0xff]   ;;  %v444_v6 = vld [vmem:[#allocation7] sm:$0xff]   ;;  %v445_v7 = vld [vmem:[#allocation7 + $0x8] sm:$0xff]  }
  0x3c   :  { %387 = vmatprep.subr.bf16.mxu0 %v435_v1  ;;  %401 = vmatprep.mubr.bf16.mxu0 %v442_v4  ;;  %v446_v8 = vld [vmem:[#allocation7 + $0x10] sm:$0xff]   ;;  %v439_v9 = vld [vmem:[#allocation5 + $0x28] sm:$0xff]   ;;  %v441_v11 = vld [vmem:[#allocation5 + $0x38] sm:$0xff]  }
  0x3d   :  { %405 = vmatprep.subr.bf16.mxu1 %v444_v6  ;;  %v440_v10 = vld [vmem:[#allocation5 + $0x30] sm:$0xff]   ;;  %v443_v12 = vld [vmem:[#allocation2 + $0x8] sm:$0xff]   ;;  %v448_v14 = vld [vmem:[#allocation7 + $0x20] sm:$0xff]  }
  0x3e   :  { %406 = vmatpush3.bf16.msra.mxu1 %v444_v6  ;;  %v447_v13 = vld [vmem:[#allocation7 + $0x18] sm:$0xff]   ;;  %v449_v15 = vld [vmem:[#allocation7 + $0x28] sm:$0xff]   ;;  %v450_v16 = vld [vmem:[#allocation7 + $0x30] sm:$0xff]  }
  0x3f   :  { %388 = vmatpush3.bf16.msra.mxu0 %v435_v1  ;;  %407 = vmatprep.subr.bf16.mxu1 %v445_v7  ;;  %v451_v17 = vld [vmem:[#allocation7 + $0x38] sm:$0xff]   ;;  %v345_v19 = vld [vmem:[%s663_s2] ss:$0 sm:$0xff]  ;;  %s556_s2 = smov [#allocation8]  }
  0x40   :  { %389 = vmatprep.subr.bf16.mxu0 %v436_v2  ;;  %v356_v31 = vld [vmem:[%s665_s4] ss:$0 sm:$0xff]  ;;  %s332_s11 = sshll.u32 %s556_s2, 4  ;;  %s333_s11 = int_to_ptr.vmem [resolvable:$true] %s332_s11 }
  0x41   :  { %s522_s12 = scalar_lea.vmem %s333_s11, 512  ;;  %p527_p13 = scmp.lt.s32.totalorder %s333_s11, %s333_s11 }
  0x42   :  { %408 = vmatpush3.bf16.msra.mxu1 %v445_v7  ;;  %p523_p12 = scmp.ne.s32.totalorder %s333_s11, %s522_s12  ;;  %p528_p0 = scmp.lt.s32.totalorder %s522_s12, %s522_s12 }
  0x43   :  { %390 = vmatpush3.bf16.msra.mxu0 %v436_v2  ;;  %409 = vmatprep.subr.bf16.mxu1 %v446_v8 }
  0x44   :  { %391 = vmatprep.subr.bf16.mxu0 %v437_v3  ;;  %p529_p1 = por %p528_p0, %p527_p13 }
  0x46   :  { %410 = vmatpush3.bf16.msra.mxu1 %v446_v8  ;;  %p530_p2 = pnand %p529_p1, %p523_p12 }
  0x47   :  { %392 = vmatpush3.bf16.msra.mxu0 %v437_v3  ;;  %411 = vmatprep.subr.bf16.mxu1 %v447_v13 }
  0x48   :  { %393 = vmatprep.subr.bf16.mxu0 %v438_v5 }
  0x4a   :  { %412 = vmatpush3.bf16.msra.mxu1 %v447_v13 }
  0x4b   :  { %394 = vmatpush3.bf16.msra.mxu0 %v438_v5  ;;  %413 = vmatprep.subr.bf16.mxu1 %v448_v14 }
  0x4c   :  { %395 = vmatprep.subr.bf16.mxu0 %v439_v9 }
  0x4e   :  { %414 = vmatpush3.bf16.msra.mxu1 %v448_v14 }
  0x4f   :  { %396 = vmatpush3.bf16.msra.mxu0 %v439_v9  ;;  %415 = vmatprep.subr.bf16.mxu1 %v449_v15 }
  0x50   :  { %397 = vmatprep.subr.bf16.mxu0 %v440_v10 }
  0x52   :  { %416 = vmatpush3.bf16.msra.mxu1 %v449_v15 }
  0x53   :  { %398 = vmatpush3.bf16.msra.mxu0 %v440_v10  ;;  %417 = vmatprep.subr.bf16.mxu1 %v450_v16 }
  0x54   :  { %399 = vmatprep.subr.bf16.mxu0 %v441_v11 }
  0x56   :  { %418 = vmatpush3.bf16.msra.mxu1 %v450_v16 }
  0x57   :  { %400 = vmatpush3.bf16.msra.mxu0 %v441_v11  ;;  %419 = vmatprep.subr.bf16.mxu1 %v451_v17 }
  0x5a   :  { %402 = vmatmul.mubr.bf16.vlgmr.msra.gmra.mrb[0].mxu0 %v443_v12  ;;  %420 = vmatpush3.bf16.msra.mxu1 %v451_v17 }
 0x12d   :  { %v403_v18 = vpop.f32.mrb[0].mxu0 }
 0x12e   :  { %v184_v20 = vpop.f32.mrb[1].mxu0  ;;  %v193_v22 = vadd.f32 %v403_v18, %v345_v19 }
 0x12f   :  { %v404_v21 = vpop.f32.mrb[2].mxu0  ;;  %v185_v25 = vadd.f32 %v345_v19, %v184_v20 }
 0x130   :  { %v196_v23 = vadd.f32 %v404_v21, %v345_v19  ;;  %v187_v24 = vpop.f32.mrb[3].mxu0 }
 0x131   :  { %v188_v26 = vadd.f32 %v345_v19, %v187_v24 }
 0x132   :  { %v200_v27 = vpack.c.bf16 %v196_v23, %v193_v22 }
 0x133   :  { %v199_v28 = vpack.c.bf16 %v188_v26, %v185_v25 }
 0x135   :  { %452 = vtanh.bf16 %v199_v28 }
 0x136   :  { %454 = vtanh.bf16 %v200_v27 }
 0x140   :  { %v453_v29 = vpop.eup %452 }
 0x141   :  { %v455_v30 = vpop.eup %454  ;;  %421 = vmatprep.mubr.bf16.mxu1 %v453_v29 }
 0x142   :  { %422 = vmatmul.mubr.bf16.vlgmr.msra.gmra.mrb[0].mxu1 %v455_v30 }
 0x215   :  { %v423_v32 = vpop.f32.mrb[0].mxu1 }
 0x216   :  { %v317_v33 = vadd.f32 %v423_v32, %v356_v31  ;;  %v308_v34 = vpop.f32.mrb[1].mxu1 }
 0x217   :  { %v309_v35 = vadd.f32 %v356_v31, %v308_v34  ;;  %v424_v36 = vpop.f32.mrb[2].mxu1 }
 0x218   :  { %325 = vst [vmem:[#allocation8 + $0x10] sm:$0xff] %v317_v33  ;;  %v320_v37 = vadd.f32 %v424_v36, %v356_v31  ;;  %v311_v38 = vpop.f32.mrb[3].mxu1 }
 0x219   :  { %323 = vst [vmem:[#allocation8] sm:$0xff] %v309_v35  ;;  %v312_v39 = vadd.f32 %v356_v31, %v311_v38 }
 0x21a   :  { %326 = vst [vmem:[#allocation8 + $0x18] sm:$0xff] %v320_v37 }
 0x21b   :  { %324 = vst [vmem:[#allocation8 + $0x8] sm:$0xff] %v312_v39 }
 0x21c   :  { %533 = shalt.err (!%p530_p2)
}
 0x21d   :  { %s534_s14 = scalar_lea.hbm %s666_s5, 512 }
 0x21e   :  { %p535_p3 = scmp.ne.s32.totalorder %s666_s5, %s534_s14  ;;  %p538_p4 = scmp.lt.u32.totalorder %s534_s14, %s666_s5 }
 0x220   :  { %p540_p5 = pnand %p538_p4, %p535_p3 }
 0x222   :  { %543 = shalt.err (!%p540_p5)
}
 0x223   :  { %s557_s1 = smov 128   ;;  %s558_s19 = smov 8  }
 0x224   :  { %338 = dma.vmem_to_hbm [thread:$0]  %s333_s11, 512, %s666_s5, [#allocation4], %s557_s1, %s557_s1, %s558_s19  }
 0x225   :  { %548 = dma.done.wait [#allocation4], 512  }
 0x226   :  { %549 = vsyncadd [#allocation4], 4294966784 }
 0x227   :  { %342 = vsyncpa [#allocation3], 1 }
 0x228   :  { %343 = vsyncpa [#allocation6], 1 }
 0x229   :  { %344 = vsyncpa [#allocation4], 1 }

// kernel: tpu_custom_call.1
= control target key start
LH: loop header
LB: loop body
LE: loop exit
PB: predicated region body
PF: predicated region fallthrough
CT: control target
= control target key end

     0   :  { %10 = vsyncpa [#allocation3], 0  ;;  %s661_s0 = inlined_call_operand.hbm [shape: bf16[32,1024], index: 0, kind: input, shape index: {}]   ;;  %s662_s1 = inlined_call_operand.hbm [shape: bf16[128,128], index: 1, kind: input, shape index: {}]   ;;  %s663_s2 = inlined_call_operand.vmem [shape: f32[1,128], index: 2, kind: input, shape index: {}]   ;;  %s664_s3 = inlined_call_operand.hbm [shape: bf16[128,128], index: 3, kind: input, shape index: {}]   ;;  %s665_s4 = inlined_call_operand.vmem [shape: f32[1,128], index: 4, kind: input, shape index: {}]   ;;  %s666_s5 = inlined_call_operand.hbm [shape: f32[32,128], index: 5, kind: output, shape index: {}]  }
   0x1   :  { %11 = vsyncpa [#allocation6], 0 }
   0x2   :  { %12 = vsyncpa [#allocation4], 0  ;;  %s550_s18 = smov [#allocation5]   ;;  %s551_s20 = smov [#allocation2]  }
   0x3   :  { %s30_s19 = sshll.u32 %s550_s18, 4  ;;  %s18_s21 = sshll.u32 %s551_s20, 4  ;;  %s31_s19 = int_to_ptr.vmem [resolvable:$true] %s30_s19  ;;  %s589_s21 = int_to_ptr.vmem [resolvable:$true] %s18_s21 }
   0x4   :  { %s456_s24 = scalar_lea.hbm %s662_s1, 1024 }
   0x5   :  { %p457_p0 = scmp.ne.s32.totalorder %s662_s1, %s456_s24  ;;  %p460_p1 = scmp.lt.u32.totalorder %s456_s24, %s662_s1 }
   0x7   :  { %p462_p2 = pnand %p460_p1, %p457_p0 }
   0x9   :  { %465 = shalt.err (!%p462_p2)
}
   0xa   :  { %s466_s29 = scalar_lea.vmem %s31_s19, 1024  ;;  %p471_p4 = scmp.lt.s32.totalorder %s31_s19, %s31_s19 }
   0xb   :  { %p467_p3 = scmp.ne.s32.totalorder %s31_s19, %s466_s29  ;;  %p472_p5 = scmp.lt.s32.totalorder %s466_s29, %s466_s29 }
   0xd   :  { %p473_p6 = por %p472_p5, %p471_p4 }
   0xf   :  { %p474_p7 = pnand %p473_p6, %p467_p3 }
  0x11   :  { %477 = shalt.err (!%p474_p7)
}
  0x12   :  { %s552_s30 = smov 64   ;;  %s553_s6 = smov 4  }
  0x13   :  { %36 = dma.hbm_to_vmem [thread:$0]  %s662_s1, 1024, %s31_s19, [#allocation6], %s552_s30, %s552_s30, %s553_s6  }
  0x14   :  { %s478_s11 = scalar_lea.hbm %s661_s0, 256  ;;  %s480_s16 = scalar_lea.hbm %s661_s0, 2048 }
  0x15   :  { %p479_p8 = scmp.ne.s32.totalorder %s661_s0, %s478_s11  ;;  %p481_p9 = scmp.lt.u32.totalorder %s480_s16, %s478_s11 }
  0x16   :  { %p482_p10 = scmp.lt.u32.totalorder %s478_s11, %s661_s0 }
  0x18   :  { %p483_p11 = por %p482_p10, %p481_p9 }
  0x1a   :  { %p484_p12 = pnand %p483_p11, %p479_p8 }
  0x1c   :  { %487 = shalt.err (!%p484_p12)
}
  0x1d   :  { %s488_s1 = scalar_lea.vmem %s589_s21, 256  ;;  %p493_p0 = scmp.lt.s32.totalorder %s589_s21, %s589_s21 }
  0x1e   :  { %p489_p13 = scmp.ne.s32.totalorder %s589_s21, %s488_s1  ;;  %p494_p1 = scmp.lt.s32.totalorder %s488_s1, %s488_s1 }
  0x20   :  { %p495_p2 = por %p494_p1, %p493_p0 }
  0x22   :  { %p496_p3 = pnand %p495_p2, %p489_p13 }
  0x24   :  { %499 = shalt.err (!%p496_p3)
}
  0x25   :  { %s554_s19 = smov 512   ;;  %s555_s23 = smov [#allocation7]  }
  0x26   :  { %24 = dma.hbm_to_vmem [thread:$0]  %s661_s0, 256, %s589_s21, [#allocation3], %s554_s19, %s552_s30, %s553_s6  }
  0x27   :  { %s44_s24 = sshll.u32 %s555_s23, 4  ;;  %s500_s27 = scalar_lea.hbm %s664_s3, 1024  ;;  %s45_s24 = int_to_ptr.vmem [resolvable:$true] %s44_s24 }
  0x28   :  { %p501_p4 = scmp.ne.s32.totalorder %s664_s3, %s500_s27  ;;  %p504_p5 = scmp.lt.u32.totalorder %s500_s27, %s664_s3 }
  0x2a   :  { %p506_p6 = pnand %p504_p5, %p501_p4 }
  0x2c   :  { %509 = shalt.err (!%p506_p6)
}
  0x2d   :  { %s510_s9 = scalar_lea.vmem %s45_s24, 1024  ;;  %p515_p8 = scmp.lt.s32.totalorder %s45_s24, %s45_s24 }
  0x2e   :  { %p511_p7 = scmp.ne.s32.totalorder %s45_s24, %s510_s9  ;;  %p516_p9 = scmp.lt.s32.totalorder %s510_s9, %s510_s9 }
  0x30   :  { %p517_p10 = por %p516_p9, %p515_p8 }
  0x32   :  { %p518_p11 = pnand %p517_p10, %p511_p7 }
  0x34   :  { %521 = shalt.err (!%p518_p11)
}
  0x35   :  { %50 = dma.hbm_to_vmem [thread:$0]  %s664_s3, 1024, %s45_s24, [#allocation6], %s552_s30, %s552_s30, %s553_s6  }
  0x36   :  { %544 = dma.done.wait [#allocation3], 256  }
  0x37   :  { %545 = vsyncadd [#allocation3], 4294967040 }
  0x38   :  { %546 = dma.done.wait [#allocation6], 2048  }
  0x39   :  { %547 = vsyncadd [#allocation6], 4294965248  ;;  %v434_v0 = vld [vmem:[#allocation5] sm:$0xff]   ;;  %v435_v1 = vld [vmem:[#allocation5 + $0x8] sm:$0xff]  }
  0x3a   :  { %385 = vmatprep.subr.bf16.mxu0 %v434_v0  ;;  %v436_v2 = vld [vmem:[#allocation5 + $0x10] sm:$0xff]   ;;  %v437_v3 = vld [vmem:[#allocation5 + $0x18] sm:$0xff]   ;;  %v438_v5 = vld [vmem:[#allocation5 + $0x20] sm:$0xff]  }
  0x3b   :  { %386 = vmatpush3.bf16.msra.mxu0 %v434_v0  ;;  %v442_v4 = vld [vmem:[#allocation2] sm:$0xff]   ;;  %v444_v6 = vld [vmem:[#allocation7] sm:$0xff]   ;;  %v445_v7 = vld [vmem:[#allocation7 + $0x8] sm:$0xff]  }
  0x3c   :  { %387 = vmatprep.subr.bf16.mxu0 %v435_v1  ;;  %401 = vmatprep.mubr.bf16.mxu0 %v442_v4  ;;  %v446_v8 = vld [vmem:[#allocation7 + $0x10] sm:$0xff]   ;;  %v439_v9 = vld [vmem:[#allocation5 + $0x28] sm:$0xff]   ;;  %v441_v11 = vld [vmem:[#allocation5 + $0x38] sm:$0xff]  }
  0x3d   :  { %405 = vmatprep.subr.bf16.mxu1 %v444_v6  ;;  %v440_v10 = vld [vmem:[#allocation5 + $0x30] sm:$0xff]   ;;  %v443_v12 = vld [vmem:[#allocation2 + $0x8] sm:$0xff]   ;;  %v448_v14 = vld [vmem:[#allocation7 + $0x20] sm:$0xff]  }
  0x3e   :  { %406 = vmatpush3.bf16.msra.mxu1 %v444_v6  ;;  %v447_v13 = vld [vmem:[#allocation7 + $0x18] sm:$0xff]   ;;  %v449_v15 = vld [vmem:[#allocation7 + $0x28] sm:$0xff]   ;;  %v450_v16 = vld [vmem:[#allocation7 + $0x30] sm:$0xff]  }
  0x3f   :  { %388 = vmatpush3.bf16.msra.mxu0 %v435_v1  ;;  %407 = vmatprep.subr.bf16.mxu1 %v445_v7  ;;  %v451_v17 = vld [vmem:[#allocation7 + $0x38] sm:$0xff]   ;;  %v345_v19 = vld [vmem:[%s663_s2] ss:$0 sm:$0xff]  ;;  %s556_s2 = smov [#allocation8]  }
  0x40   :  { %389 = vmatprep.subr.bf16.mxu0 %v436_v2  ;;  %v356_v31 = vld [vmem:[%s665_s4] ss:$0 sm:$0xff]  ;;  %s332_s11 = sshll.u32 %s556_s2, 4  ;;  %s333_s11 = int_to_ptr.vmem [resolvable:$true] %s332_s11 }
  0x41   :  { %s522_s12 = scalar_lea.vmem %s333_s11, 512  ;;  %p527_p13 = scmp.lt.s32.totalorder %s333_s11, %s333_s11 }
  0x42   :  { %408 = vmatpush3.bf16.msra.mxu1 %v445_v7  ;;  %p523_p12 = scmp.ne.s32.totalorder %s333_s11, %s522_s12  ;;  %p528_p0 = scmp.lt.s32.totalorder %s522_s12, %s522_s12 }
  0x43   :  { %390 = vmatpush3.bf16.msra.mxu0 %v436_v2  ;;  %409 = vmatprep.subr.bf16.mxu1 %v446_v8 }
  0x44   :  { %391 = vmatprep.subr.bf16.mxu0 %v437_v3  ;;  %p529_p1 = por %p528_p0, %p527_p13 }
  0x46   :  { %410 = vmatpush3.bf16.msra.mxu1 %v446_v8  ;;  %p530_p2 = pnand %p529_p1, %p523_p12 }
  0x47   :  { %392 = vmatpush3.bf16.msra.mxu0 %v437_v3  ;;  %411 = vmatprep.subr.bf16.mxu1 %v447_v13 }
  0x48   :  { %393 = vmatprep.subr.bf16.mxu0 %v438_v5 }
  0x4a   :  { %412 = vmatpush3.bf16.msra.mxu1 %v447_v13 }
  0x4b   :  { %394 = vmatpush3.bf16.msra.mxu0 %v438_v5  ;;  %413 = vmatprep.subr.bf16.mxu1 %v448_v14 }
  0x4c   :  { %395 = vmatprep.subr.bf16.mxu0 %v439_v9 }
  0x4e   :  { %414 = vmatpush3.bf16.msra.mxu1 %v448_v14 }
  0x4f   :  { %396 = vmatpush3.bf16.msra.mxu0 %v439_v9  ;;  %415 = vmatprep.subr.bf16.mxu1 %v449_v15 }
  0x50   :  { %397 = vmatprep.subr.bf16.mxu0 %v440_v10 }
  0x52   :  { %416 = vmatpush3.bf16.msra.mxu1 %v449_v15 }
  0x53   :  { %398 = vmatpush3.bf16.msra.mxu0 %v440_v10  ;;  %417 = vmatprep.subr.bf16.mxu1 %v450_v16 }
  0x54   :  { %399 = vmatprep.subr.bf16.mxu0 %v441_v11 }
  0x56   :  { %418 = vmatpush3.bf16.msra.mxu1 %v450_v16 }
  0x57   :  { %400 = vmatpush3.bf16.msra.mxu0 %v441_v11  ;;  %419 = vmatprep.subr.bf16.mxu1 %v451_v17 }
  0x5a   :  { %402 = vmatmul.mubr.bf16.vlgmr.msra.gmra.mrb[0].mxu0 %v443_v12  ;;  %420 = vmatpush3.bf16.msra.mxu1 %v451_v17 }
 0x12d   :  { %v403_v18 = vpop.f32.mrb[0].mxu0 }
 0x12e   :  { %v184_v20 = vpop.f32.mrb[1].mxu0  ;;  %v193_v22 = vadd.f32 %v403_v18, %v345_v19 }
 0x12f   :  { %v404_v21 = vpop.f32.mrb[2].mxu0  ;;  %v185_v25 = vadd.f32 %v345_v19, %v184_v20 }
 0x130   :  { %v196_v23 = vadd.f32 %v404_v21, %v345_v19  ;;  %v187_v24 = vpop.f32.mrb[3].mxu0 }
 0x131   :  { %v188_v26 = vadd.f32 %v345_v19, %v187_v24 }
 0x132   :  { %v200_v27 = vpack.c.bf16 %v196_v23, %v193_v22 }
 0x133   :  { %v199_v28 = vpack.c.bf16 %v188_v26, %v185_v25 }
 0x135   :  { %452 = vtanh.bf16 %v199_v28 }
 0x136   :  { %454 = vtanh.bf16 %v200_v27 }
 0x140   :  { %v453_v29 = vpop.eup %452 }
 0x141   :  { %v455_v30 = vpop.eup %454  ;;  %421 = vmatprep.mubr.bf16.mxu1 %v453_v29 }
 0x142   :  { %422 = vmatmul.mubr.bf16.vlgmr.msra.gmra.mrb[0].mxu1 %v455_v30 }
 0x215   :  { %v423_v32 = vpop.f32.mrb[0].mxu1 }
 0x216   :  { %v317_v33 = vadd.f32 %v423_v32, %v356_v31  ;;  %v308_v34 = vpop.f32.mrb[1].mxu1 }
 0x217   :  { %v309_v35 = vadd.f32 %v356_v31, %v308_v34  ;;  %v424_v36 = vpop.f32.mrb[2].mxu1 }
 0x218   :  { %325 = vst [vmem:[#allocation8 + $0x10] sm:$0xff] %v317_v33  ;;  %v320_v37 = vadd.f32 %v424_v36, %v356_v31  ;;  %v311_v38 = vpop.f32.mrb[3].mxu1 }
 0x219   :  { %323 = vst [vmem:[#allocation8] sm:$0xff] %v309_v35  ;;  %v312_v39 = vadd.f32 %v356_v31, %v311_v38 }
 0x21a   :  { %326 = vst [vmem:[#allocation8 + $0x18] sm:$0xff] %v320_v37 }
 0x21b   :  { %324 = vst [vmem:[#allocation8 + $0x8] sm:$0xff] %v312_v39 }
 0x21c   :  { %533 = shalt.err (!%p530_p2)
}
 0x21d   :  { %s534_s14 = scalar_lea.hbm %s666_s5, 512 }
 0x21e   :  { %p535_p3 = scmp.ne.s32.totalorder %s666_s5, %s534_s14  ;;  %p538_p4 = scmp.lt.u32.totalorder %s534_s14, %s666_s5 }
 0x220   :  { %p540_p5 = pnand %p538_p4, %p535_p3 }
 0x222   :  { %543 = shalt.err (!%p540_p5)
}
 0x223   :  { %s557_s1 = smov 128   ;;  %s558_s19 = smov 8  }
 0x224   :  { %338 = dma.vmem_to_hbm [thread:$0]  %s333_s11, 512, %s666_s5, [#allocation4], %s557_s1, %s557_s1, %s558_s19  }
 0x225   :  { %548 = dma.done.wait [#allocation4], 512  }
 0x226   :  { %549 = vsyncadd [#allocation4], 4294966784 }
 0x227   :  { %342 = vsyncpa [#allocation3], 1 }
 0x228   :  { %343 = vsyncpa [#allocation6], 1 }
 0x229   :  { %344 = vsyncpa [#allocation4], 1 }

</bundles_post_ra>
